<compile_context>
chip_gen: v7x
topology: tpu7x:2x2x1
jax: 0.10.0
libtpu: 0.0.40
codegen_flags: <defaults>
</compile_context>

<pallas_src>
import functools

import jax
import jax.numpy as jnp
import numpy as np
from jax import lax
from jax.experimental import pallas as pl
from jax.experimental.pallas import tpu as pltpu

KERNEL_SIZE = 16
N_FILTERS = 32
STRIDE = 8


def fb_kernel(chunks_ref, halo_ref, w_ref, out_ref, *, stride, ratio, f_blk, n_frames):
    """One grid step == F_BLK analysis frames (fused enc+dec + in-block overlap-add).

    chunks_ref: (B, F_BLK, stride)            waveform chunks f0 .. f0+F_BLK-1
    halo_ref  : (1, B, ratio-1, stride)       next ratio-1 chunks (frame-overlap halo)
    w_ref     : (K, K)                        fused weights  W = enc^T @ dec
    out_ref   : (1, B, F_BLK+ratio-1, stride) this block's overlap-added contribution
    """
    b = chunks_ref.shape[0]
    k = ratio * stride
    m = b * f_blk

    # Chunks for local frames 0..F_BLK-1 plus the (ratio-1)-chunk halo of the next block.
    ext = jnp.concatenate([chunks_ref[...], halo_ref[0]], axis=1)   # (B, F_BLK+ratio-1, s)

    # Fused conv1d + conv_transpose1d: contrib = frames @ W.  Frame f spans chunks
    # f..f+ratio-1, so the fused matmul decomposes into `ratio` sublane-aligned
    # chunk-shift matmuls over the same big M = B*F_BLK dimension (identical FLOPs).
    contrib = jnp.zeros((m, k), jnp.float32)
    for j in range(ratio):
        xj = ext[:, j:j + f_blk, :].reshape(m, stride)              # (M, s)
        contrib = contrib + jnp.dot(xj, w_ref[j * stride:(j + 1) * stride, :],
                                    preferred_element_type=jnp.float32)
    contrib = contrib.reshape(b, f_blk, k)

    # Zero the padding frames (global frame index >= n_frames) of the last block.
    fidx = pl.program_id(0) * f_blk + lax.broadcasted_iota(jnp.int32, (b, f_blk, k), 1)
    contrib = jnp.where(fidx < n_frames, contrib, 0.0)

    # Dense in-block overlap-add: out chunk r accumulates contrib[:, r - j, j*s:(j+1)*s].
    # Bulk slab stores (static offsets) instead of per-frame RMW of (B, stride) slices.
    out_ref[0, :, :f_blk, :] = contrib[:, :, :stride]
    out_ref[0, :, f_blk:, :] = jnp.zeros((b, ratio - 1, stride), jnp.float32)
    for j in range(1, ratio):
        cur = out_ref[0, :, j:j + f_blk, :]
        out_ref[0, :, j:j + f_blk, :] = cur + contrib[:, :, j * stride:(j + 1) * stride]


@functools.partial(jax.jit, static_argnames=("kernel_size", "stride", "f_blk_target"))
def dummy_model_forward(wav, enc_w, dec_w, *, kernel_size=KERNEL_SIZE, stride=STRIDE,
                        f_blk_target=128):
    """wav: (B, T) f32; enc_w, dec_w: (N, K) f32 (torch shape (N, 1, K) squeezed)."""
    B, T = wav.shape
    N, K = enc_w.shape
    assert K == kernel_size and K % stride == 0
    ratio = K // stride
    # TODO(synk): ratio == 1 (kernel_size == stride, no frame overlap) would need a
    # halo-free variant; make_enc_dec's non-default padding/output_padding not modeled.
    assert ratio >= 2
    F = (T - K) // stride + 1
    assert F >= 1
    t_out = (F - 1) * stride + K

    # Frame-block size: multiple of 8 (sublanes); default 128 so M = B*F_BLK fills the MXU.
    f_blk = min(f_blk_target, ((F + 7) // 8) * 8)
    f_blk = max(8, (f_blk // 8) * 8)
    assert f_blk >= ratio - 1
    nb = -(-F // f_blk)                 # grid steps
    f_pad = nb * f_blk                  # frames incl. padding (masked in-kernel)

    # Fused filterbank: contrib_frame = frame @ W with W = enc^T @ dec  (K, K).
    w_fused = jnp.dot(enc_w.T.astype(jnp.float32), dec_w.astype(jnp.float32))

    # Waveform as non-overlapping stride-chunks (pure reshape, no 2x frame duplication)
    # plus a tiny (ratio-1)-chunk halo per block.
    needed = (f_pad + ratio - 1) * stride
    if T >= needed:
        wav_p = wav[:, :needed].astype(jnp.float32)
    else:
        wav_p = jnp.pad(wav.astype(jnp.float32), ((0, 0), (0, needed - T)))
    chunks_all = wav_p.reshape(B, f_pad + ratio - 1, stride)
    hidx = (jnp.arange(nb)[:, None] + 1) * f_blk + jnp.arange(ratio - 1)[None, :]
    halos = jnp.transpose(chunks_all[:, hidx, :], (1, 0, 2, 3))     # (nb, B, ratio-1, s)

    out_blocks = pl.pallas_call(
        functools.partial(fb_kernel, stride=stride, ratio=ratio, f_blk=f_blk, n_frames=F),
        grid=(nb,),
        in_specs=[
            pl.BlockSpec((B, f_blk, stride), lambda i: (0, i, 0)),
            pl.BlockSpec((1, B, ratio - 1, stride), lambda i: (i, 0, 0, 0)),
            pl.BlockSpec((K, K), lambda i: (0, 0)),
        ],
        out_specs=pl.BlockSpec((1, B, f_blk + ratio - 1, stride), lambda i: (i, 0, 0, 0)),
        out_shape=jax.ShapeDtypeStruct((nb, B, f_blk + ratio - 1, stride), jnp.float32),
        compiler_params=pltpu.CompilerParams(
            dimension_semantics=("parallel",),      # no cross-step state -> megacore OK (v7x)
            vmem_limit_bytes=32 * 1024 * 1024,      # blocks are KB-sized; explicit & safe on all gens
        ),
    )(chunks_all, halos, w_fused)

    # Glue: stitch per-block outputs; only the (K - stride)-sample block tails overlap.
    main = out_blocks[:, :, :f_blk, :]                               # (nb, B, F_BLK, s)
    tails = out_blocks[:, :, f_blk:, :]                              # (nb, B, ratio-1, s)
    main_flat = jnp.transpose(main, (1, 0, 2, 3)).reshape(B, nb * f_blk * stride)
    tails_pad = jnp.pad(tails, ((0, 0), (0, 0), (0, f_blk - (ratio - 1)), (0, 0)))
    tails_flat = jnp.transpose(tails_pad, (1, 0, 2, 3)).reshape(B, nb * f_blk * stride)
    halo_len = (ratio - 1) * stride
    total = nb * f_blk * stride + halo_len
    full = jnp.pad(main_flat, ((0, 0), (0, halo_len)))
    full = full + jnp.pad(tails_flat, ((0, 0), (f_blk * stride, 0)))[:, :total]
    return full[:, :t_out]


if __name__ == "__main__":
    key = jax.random.PRNGKey(0)
    k_wav, k_enc, k_dec = jax.random.split(key, 3)

    B, T = 2, 64
    wav = jax.random.normal(k_wav, (B, T), dtype=jnp.float32)
    # FreeFB parameters (torch shape (n_filters, 1, kernel_size)), deterministic init.
    enc_w = jax.random.normal(k_enc, (N_FILTERS, KERNEL_SIZE), dtype=jnp.float32)
    dec_w = jax.random.normal(k_dec, (N_FILTERS, KERNEL_SIZE), dtype=jnp.float32)

    wav_back = dummy_model_forward(wav, enc_w, dec_w)
    jax.block_until_ready(wav_back)

    # Independent numpy reference: conv1d(stride) followed by conv_transpose1d(stride).
    wav_np = np.asarray(wav)
    enc_np = np.asarray(enc_w)
    dec_np = np.asarray(dec_w)
    F = (T - KERNEL_SIZE) // STRIDE + 1
    t_out = (F - 1) * STRIDE + KERNEL_SIZE
    tf_rep = np.zeros((B, N_FILTERS, F), np.float32)
    for f in range(F):
        seg = wav_np[:, f * STRIDE:f * STRIDE + KERNEL_SIZE]         # (B, K)
        tf_rep[:, :, f] = seg @ enc_np.T
    ref = np.zeros((B, t_out), np.float32)
    for f in range(F):
        ref[:, f * STRIDE:f * STRIDE + KERNEL_SIZE] += tf_rep[:, :, f] @ dec_np

    # atol slightly looser than 1e-5: the enc@dec fusion changes f32 summation order.
    np.testing.assert_allclose(np.asarray(wav_back), ref, rtol=1e-5, atol=5e-5)
    print("KERNEL_OK")
</pallas_src>

<mosaic_0001>
module attributes {stable_mosaic.version = 11 : i64} {
  func.func @fb_kernel(%arg0: i32, %arg1: memref<2x8x8xf32, #tpu.memory_space<vmem>>, %arg2: memref<1x2x1x8xf32, #tpu.memory_space<vmem>>, %arg3: memref<16x16xf32, #tpu.memory_space<vmem>>, %arg4: memref<1x2x9x8xf32, #tpu.memory_space<vmem>>) attributes {dimension_semantics = [#tpu.dimension_semantics<parallel>], iteration_bounds = array<i64: 1>, scalar_prefetch = 0 : i64, scratch_operands = 0 : i64, tpu.core_type = #tpu.core_type<tc>, window_params = [{transform_indices = @transform_0, window_bounds = array<i64: 2, 8, 8>}, {transform_indices = @transform_1, window_bounds = array<i64: 1, 2, 1, 8>}, {pipeline_mode = #tpu.pipeline_mode<synchronous>, transform_indices = @transform_2, window_bounds = array<i64: 16, 16>}, {transform_indices = @transform_3, window_bounds = array<i64: 1, 2, 9, 8>}]} {
    %c0 = arith.constant 0 : index
    %c0_0 = arith.constant 0 : index
    %c0_1 = arith.constant 0 : index
    %0 = vector.load %arg1[%c0, %c0_0, %c0_1] : memref<2x8x8xf32, #tpu.memory_space<vmem>>, vector<2x8x8xf32>
    %c0_2 = arith.constant 0 : index
    %c0_3 = arith.constant 0 : index
    %c0_4 = arith.constant 0 : index
    %c0_5 = arith.constant 0 : index
    %1 = vector.load %arg2[%c0_2, %c0_3, %c0_4, %c0_5] : memref<1x2x1x8xf32, #tpu.memory_space<vmem>>, vector<1x2x1x8xf32>
    %2 = vector.shape_cast %1 : vector<1x2x1x8xf32> to vector<2x1x8xf32>
    %3 = tpu.concatenate %0, %2 in 1 : vector<2x8x8xf32>, vector<2x1x8xf32> -> vector<2x9x8xf32>
    %cst = arith.constant 0.000000e+00 : f32
    %4 = vector.broadcast %cst : f32 to vector<16x16xf32>
    %5 = vector.extract_strided_slice %3 {offsets = [0, 0, 0], sizes = [2, 8, 8], strides = [1, 1, 1]} : vector<2x9x8xf32> to vector<2x8x8xf32>
    %6 = vector.shape_cast %5 : vector<2x8x8xf32> to vector<16x8xf32>
    %c0_6 = arith.constant 0 : index
    %c0_7 = arith.constant 0 : index
    %7 = vector.load %arg3[%c0_6, %c0_7] : memref<16x16xf32, #tpu.memory_space<vmem>>, vector<8x16xf32>
    %cst_8 = arith.constant dense<0.000000e+00> : vector<16x16xf32>
    %8 = tpu.matmul %6, %7, %cst_8 {dimension_numbers = #tpu.dot_dimension_numbers<[1], [0], [0], [1], [0, 0, 1, 1], [], []>} : vector<16x8xf32>, vector<8x16xf32>, vector<16x16xf32> -> vector<16x16xf32>
    %9 = arith.addf %4, %8 : vector<16x16xf32>
    %10 = vector.extract_strided_slice %3 {offsets = [0, 1, 0], sizes = [2, 8, 8], strides = [1, 1, 1]} : vector<2x9x8xf32> to vector<2x8x8xf32>
    %11 = vector.shape_cast %10 : vector<2x8x8xf32> to vector<16x8xf32>
    %c8 = arith.constant 8 : index
    %c0_9 = arith.constant 0 : index
    %12 = vector.load %arg3[%c8, %c0_9] : memref<16x16xf32, #tpu.memory_space<vmem>>, vector<8x16xf32>
    %cst_10 = arith.constant dense<0.000000e+00> : vector<16x16xf32>
    %13 = tpu.matmul %11, %12, %cst_10 {dimension_numbers = #tpu.dot_dimension_numbers<[1], [0], [0], [1], [0, 0, 1, 1], [], []>} : vector<16x8xf32>, vector<8x16xf32>, vector<16x16xf32> -> vector<16x16xf32>
    %14 = arith.addf %9, %13 : vector<16x16xf32>
    %15 = vector.shape_cast %14 : vector<16x16xf32> to vector<2x8x16xf32>
    %c8_i32 = arith.constant 8 : i32
    %16 = arith.muli %arg0, %c8_i32 : i32
    %17 = tpu.iota {dimensions = array<i32: 1>} : vector<2x8x16xi32>
    %18 = vector.broadcast %16 : i32 to vector<2x8x16xi32>
    %19 = arith.addi %18, %17 : vector<2x8x16xi32>
    %c7_i32 = arith.constant 7 : i32
    %20 = vector.broadcast %c7_i32 : i32 to vector<2x8x16xi32>
    %21 = arith.cmpi slt, %19, %20 : vector<2x8x16xi32>
    %cst_11 = arith.constant 0.000000e+00 : f32
    %22 = vector.broadcast %cst_11 : f32 to vector<2x8x16xf32>
    %23 = arith.select %21, %15, %22 : vector<2x8x16xi1>, vector<2x8x16xf32>
    %24 = vector.extract_strided_slice %23 {offsets = [0, 0, 0], sizes = [2, 8, 8], strides = [1, 1, 1]} : vector<2x8x16xf32> to vector<2x8x8xf32>
    %c0_12 = arith.constant 0 : index
    %c0_13 = arith.constant 0 : index
    %c0_14 = arith.constant 0 : index
    %c0_15 = arith.constant 0 : index
    %25 = vector.load %arg4[%c0_12, %c0_13, %c0_14, %c0_15] : memref<1x2x9x8xf32, #tpu.memory_space<vmem>>, vector<1x2x8x8xf32>
    %26 = vector.shape_cast %25 : vector<1x2x8x8xf32> to vector<2x8x8xf32>
    %27 = vector.shape_cast %24 : vector<2x8x8xf32> to vector<1x2x8x8xf32>
    tpu.vector_store %arg4[%c0_12, %c0_13, %c0_14, %c0_15], %27 {strides = array<i32>} : memref<1x2x9x8xf32, #tpu.memory_space<vmem>>, vector<1x2x8x8xf32>,
    %cst_16 = arith.constant 0.000000e+00 : f32
    %28 = vector.broadcast %cst_16 : f32 to vector<2x1x8xf32>
    %c0_17 = arith.constant 0 : index
    %c0_18 = arith.constant 0 : index
    %c8_19 = arith.constant 8 : index
    %c0_20 = arith.constant 0 : index
    %29 = vector.load %arg4[%c0_17, %c0_18, %c8_19, %c0_20] : memref<1x2x9x8xf32, #tpu.memory_space<vmem>>, vector<1x2x1x8xf32>
    %30 = vector.shape_cast %29 : vector<1x2x1x8xf32> to vector<2x1x8xf32>
    %31 = vector.shape_cast %28 : vector<2x1x8xf32> to vector<1x2x1x8xf32>
    tpu.vector_store %arg4[%c0_17, %c0_18, %c8_19, %c0_20], %31 {strides = array<i32>} : memref<1x2x9x8xf32, #tpu.memory_space<vmem>>, vector<1x2x1x8xf32>,
    %c0_21 = arith.constant 0 : index
    %c0_22 = arith.constant 0 : index
    %c1 = arith.constant 1 : index
    %c0_23 = arith.constant 0 : index
    %32 = vector.load %arg4[%c0_21, %c0_22, %c1, %c0_23] : memref<1x2x9x8xf32, #tpu.memory_space<vmem>>, vector<1x2x8x8xf32>
    %33 = vector.shape_cast %32 : vector<1x2x8x8xf32> to vector<2x8x8xf32>
    %34 = vector.extract_strided_slice %23 {offsets = [0, 0, 8], sizes = [2, 8, 8], strides = [1, 1, 1]} : vector<2x8x16xf32> to vector<2x8x8xf32>
    %35 = arith.addf %33, %34 : vector<2x8x8xf32>
    %c0_24 = arith.constant 0 : index
    %c0_25 = arith.constant 0 : index
    %c1_26 = arith.constant 1 : index
    %c0_27 = arith.constant 0 : index
    %36 = vector.load %arg4[%c0_24, %c0_25, %c1_26, %c0_27] : memref<1x2x9x8xf32, #tpu.memory_space<vmem>>, vector<1x2x8x8xf32>
    %37 = vector.shape_cast %36 : vector<1x2x8x8xf32> to vector<2x8x8xf32>
    %38 = vector.shape_cast %35 : vector<2x8x8xf32> to vector<1x2x8x8xf32>
    tpu.vector_store %arg4[%c0_24, %c0_25, %c1_26, %c0_27], %38 {strides = array<i32>} : memref<1x2x9x8xf32, #tpu.memory_space<vmem>>, vector<1x2x8x8xf32>,
    return
  }
  func.func @transform_0(%arg0: i32) -> (i32, i32, i32) {
    %c0_i32 = arith.constant 0 : i32
    %c0_i32_0 = arith.constant 0 : i32
    %c0_i32_1 = arith.constant 0 : i32
    return %c0_i32, %arg0, %c0_i32_0 : i32, i32, i32
  }
  func.func @transform_1(%arg0: i32) -> (i32, i32, i32, i32) {
    %c0_i32 = arith.constant 0 : i32
    %c0_i32_0 = arith.constant 0 : i32
    %c0_i32_1 = arith.constant 0 : i32
    %c0_i32_2 = arith.constant 0 : i32
    return %arg0, %c0_i32, %c0_i32_0, %c0_i32_1 : i32, i32, i32, i32
  }
  func.func @transform_2(%arg0: i32) -> (i32, i32) {
    %c0_i32 = arith.constant 0 : i32
    %c0_i32_0 = arith.constant 0 : i32
    %c0_i32_1 = arith.constant 0 : i32
    return %c0_i32, %c0_i32_0 : i32, i32
  }
  func.func @transform_3(%arg0: i32) -> (i32, i32, i32, i32) {
    %c0_i32 = arith.constant 0 : i32
    %c0_i32_0 = arith.constant 0 : i32
    %c0_i32_1 = arith.constant 0 : i32
    %c0_i32_2 = arith.constant 0 : i32
    return %arg0, %c0_i32, %c0_i32_0, %c0_i32_1 : i32, i32, i32, i32
  }
}

</mosaic_0001>

<bundles_post_ra>
// kernel: dummy_model_forward.1
= control target key start
LH: loop header
LB: loop body
LE: loop exit
PB: predicated region body
PF: predicated region fallthrough
CT: control target
= control target key end

     0   :  { %vm69_vm0 = vcmask 64512   ;;  %vm61_vm1 = vcmask 1046528   ;;  %vm238_vm2 = vcmask 57344   ;;  %v287_v12 = vmov 0.0   ;;  %s288_s27 = smov 120   ;;  %s359_s0 = inlined_call_operand.vmem [shape: f32[2,9,8], index: 0, kind: input, shape index: {}]   ;;  %s360_s1 = inlined_call_operand.vmem [shape: f32[1,2,1,8], index: 1, kind: input, shape index: {}]   ;;  %s361_s2 = inlined_call_operand.vmem [shape: f32[16,16], index: 2, kind: input, shape index: {}]   ;;  %s362_s3 = inlined_call_operand.vmem [shape: f32[1,2,9,8], index: 3, kind: output, shape index: {}]  }
   0x1   :  { %v56_v0 = vld [vmem:[%s361_s2] sm:$0xff]  ;;  %v68_v1 = vld [vmem:[%s361_s2 + $0x8] sm:$0xff]  ;;  %v41_v5 = vld [vmem:[%s359_s0 + $0x10] sm:$0xff]  ;;  %239 = vst.msk [vmem:[%s362_s3 + $0x8] sm:$0x1] %vm238_vm2, %v287_v12  ;;  %v229_v13 = vlaneseq }
   0x2   :  { %v39_v2 = vld [vmem:[%s359_s0] sm:$0xff]  ;;  %278 = vmatprep.subr.mxu0 %v56_v0  ;;  %273 = vmatprep.subr.mxu1 %v68_v1  ;;  %v65_v8 = vrot.slane %v41_v5, 1  ;;  %240 = vst.msk [vmem:[%s362_s3 + $0x18] sm:$0x1] %vm238_vm2, %v287_v12 }
   0x3   :  { %v62_v3 = vrot.slane %v39_v2, 1  ;;  %v54_v4 = vld [vmem:[%s360_s1] sm:$0x1]  ;;  %v55_v6 = vld [vmem:[%s360_s1 + $0x1] sm:$0x1]  ;;  %279 = vmatpush3.msra.mxu0 %v56_v0  ;;  %280 = vmatprep.mubr.msk.f32.mxu0 %vm69_vm0, %v39_v2  ;;  %v230_v14 = vshrl.u32 %v229_v13, 7 }
   0x4   :  { %v63_v7 = vrot.slane %v54_v4, 1  ;;  %v66_v9 = vrot.slane %v55_v6, 1  ;;  %274 = vmatpush3.msra.mxu1 %v68_v1  ;;  %281 = vmatmul.mubr.msk.f32.vlgmr.msra.gmra.mrb[0].mxu0 %vm69_vm0, %v41_v5 }
   0x5   :  { %vm233_vm3 = vcmp.lt.s32.totalorder %v230_v14, 7 }
   0x6   :  { %v64_v10 = vsel %vm61_vm1, %v62_v3, %v63_v7  ;;  %v67_v11 = vsel %vm61_vm1, %v65_v8, %v66_v9 }
   0x7   :  { %275 = vmatprep.mubr.msk.f32.mxu1 %vm69_vm0, %v64_v10 }
   0x8   :  { %276 = vmatmul.mubr.msk.f32.vlgmr.msra.gmra.mrb[0].mxu1 %vm69_vm0, %v67_v11 }
  0xd7   :  { %v282_v15 = vpop.f32.mrb[0].mxu0 }
  0xd8   :  { %v219_v16 = vpop.f32.mrb[1].mxu0 }
  0xdb   :  { %v277_v17 = vpop.f32.mrb[0].mxu1 }
  0xdc   :  { %v225_v18 = vadd.f32 %v282_v15, %v277_v17  ;;  %v140_v19 = vpop.f32.mrb[1].mxu1 }
  0xdd   :  { %v220_v20 = vadd.f32 %v219_v16, %v140_v19 }
  0xde   :  { %v235_v21 = vsel %vm233_vm3, %v225_v18, 0.0 }
  0xdf   :  { %v234_v22 = vsel %vm233_vm3, %v220_v20, 0.0  ;;  %237 = vst.msk [vmem:[%s362_s3 + $0x10] sm:$0xff] %vm69_vm0, %v235_v21 }
  0xe0   :  { %245 = vrot.lane.b32.xlu0 %v234_v22, %s288_s27  ;;  %236 = vst.msk [vmem:[%s362_s3] sm:$0xff] %vm69_vm0, %v234_v22 }
  0xe4   :  { %247 = vrot.lane.b32.xlu0 %v235_v21, %s288_s27 }
  0xe6   :  { %v242_v26 = vld [vmem:[%s362_s3 + $0x11] sm:$0xff] }
  0xe7   :  { %v241_v24 = vld [vmem:[%s362_s3 + $0x1] sm:$0xff] }
 0x152   :  { %v246_v23 = vpop.permute.xlu0 %245 }
 0x153   :  { %v251_v25 = vadd.f32 %v246_v23, %v241_v24 }
 0x155   :  { %253 = vst.msk [vmem:[%s362_s3 + $0x1] sm:$0xff] %vm69_vm0, %v251_v25 }
 0x156   :  { %v248_v27 = vpop.permute.xlu0 %247 }
 0x157   :  { %v252_v28 = vadd.f32 %v248_v27, %v242_v26 }
 0x159   :  { %254 = vst.msk [vmem:[%s362_s3 + $0x11] sm:$0xff] %vm69_vm0, %v252_v28 }

</bundles_post_ra>
